<compile_context>
chip_gen: v6e
topology: v6e:2x2x1
jax: 0.10.0
libtpu: 0.0.40
codegen_flags: <defaults>
</compile_context>

<pallas_src>
import jax
import jax.numpy as jnp
from jax.experimental import pallas as pl
from jax.experimental.pallas import tpu as pltpu


# --------------------------------------------------------------------------
# Shared in-kernel gate math (transposed layout: batch on lanes)
# --------------------------------------------------------------------------
def _gru_gate_update(h_prev32, x32, w_ref, b_ref):
    """h_prev32:(H,bm) f32, x32:(I,bm) f32, w_ref:(3H,H+I), b_ref:(3H,1) -> (H,bm) f32."""
    H = h_prev32.shape[0]
    # Sublane concat (H and I are multiples of 8) -> hx:(H+I, bm); h rows first,
    # matching hx = cat([h, x], -1) in the reference.
    hx = jnp.concatenate([h_prev32, x32], axis=0)
    # Single fused K=(H+I) MXU pass; f32 accumulation.
    # NOTE: default MXU precision (bf16-truncated inputs) is used; for bit-level
    # parity with PyTorch fp32 pass precision=jax.lax.Precision.HIGHEST.
    gate = (jnp.dot(w_ref[...], hx, preferred_element_type=jnp.float32)
            + b_ref[...].astype(jnp.float32))                     # (3H, bm)
    # r/c/u are sublane slices (rows), free addressing in this layout.
    reset = jax.nn.sigmoid(gate[0 * H:1 * H, :])                  # EUP
    cand = jnp.tanh(reset * gate[1 * H:2 * H, :])                 # EUP
    update = jax.nn.sigmoid(gate[2 * H:3 * H, :])                 # EUP
    return update * cand + (1.0 - update) * h_prev32


# --------------------------------------------------------------------------
# Kernels
# --------------------------------------------------------------------------
def _block_gru_step_kernel(x_ref, h_ref, w_ref, b_ref, out_ref):
    # x_ref:(I,bm), h_ref:(H,bm), w_ref:(3H,H+I), b_ref:(3H,1), out_ref:(H,bm)
    h_prev = h_ref[...].astype(jnp.float32)
    h_new = _gru_gate_update(h_prev, x_ref[...].astype(jnp.float32), w_ref, b_ref)
    out_ref[...] = h_new.astype(out_ref.dtype)


def _block_gru_seq_kernel(x_ref, h0_ref, w_ref, b_ref, hseq_ref, h_acc):
    # Fused recurrence: grid = (B//bm, T); h lives in VMEM scratch h_acc across t.
    # x_ref:(I,bm) (time-sliced), h0_ref:(H,bm), hseq_ref:(H,bm) slab at step t.
    @pl.when(pl.program_id(1) == 0)
    def _():
        h_acc[...] = h0_ref[...].astype(jnp.float32)

    h_new = _gru_gate_update(h_acc[...], x_ref[...].astype(jnp.float32),
                             w_ref, b_ref)
    h_acc[...] = h_new
    hseq_ref[...] = h_new.astype(hseq_ref.dtype)


# --------------------------------------------------------------------------
# Parameter preprocessing (done ONCE, outside the per-step path)
# --------------------------------------------------------------------------
def prepare_block_gru_params(weight, bias, hidden_size):
    """weight:(G,out_per,in_per), bias:(3H,) -> (w_t:(3H, H+I), b_t:(3H, 1)).

    Densifies the block-diagonal weight W_bd:(H+I, 3H) so hx @ W_bd ==
    BlockLinear(hx), then transposes it for the lane-transposed kernels
    (gate_T = w_t @ hx_T).  Rows 0:H of W_bd correspond to h, rows H: to x.

    NOTE(scaling): densifying inflates matmul work by a factor of G.  Harmless
    at H=32 (everything pads to the MXU tile anyway); if H grows to hundreds,
    keep the block structure (per-block matmuls / grid over G) instead."""
    G, out_per, in_per = weight.shape
    in_features = G * in_per
    out_features = G * out_per

    eye = jnp.eye(G, dtype=weight.dtype)                          # (G, G)
    # W_bd[g*in_per + i, g2*out_per + o] = weight[g, o, i] * delta(g, g2)
    w_bd = jnp.einsum('goi,gh->giho', weight, eye).reshape(in_features, out_features)

    w_t = w_bd.T                                                  # (3H, H+I)
    b_t = bias.reshape(out_features, 1)                           # (3H, 1)
    assert in_features > hidden_size  # sanity: hx = [h, x]
    return w_t, b_t


def _choose_bm(B, cap=2048):
    """Batch tile (lane dim): biggest multiple of 128 dividing B, up to `cap`;
    falls back to the full batch for small / odd B.
    NOTE(v7x): with 2 TensorCores, prefer a bm that yields a grid of >= 2
    blocks for large B; on v5e/v6e (1 TC) a single full-batch block is best."""
    top = (min(cap, B) // 128) * 128
    for cand in range(top, 0, -128):
        if B % cand == 0:
            return cand
    return B


# --------------------------------------------------------------------------
# Hot-path entry points (transposed layout: batch on lanes)
# --------------------------------------------------------------------------
def block_gru_cell_step_t(x_t, h_t, w_t, b_t):
    """Single GRU step. x_t:(I,B), h_t:(H,B) -> (H,B)."""
    I, B = x_t.shape
    H = h_t.shape[0]
    assert w_t.shape == (3 * H, H + I)
    assert b_t.shape == (3 * H, 1)

    bm = _choose_bm(B)
    grid = (B // bm,)

    return pl.pallas_call(
        _block_gru_step_kernel,
        out_shape=jax.ShapeDtypeStruct((H, B), h_t.dtype),
        grid_spec=pltpu.PrefetchScalarGridSpec(
            num_scalar_prefetch=0,
            grid=grid,
            in_specs=[
                pl.BlockSpec((I, bm), lambda i: (0, i)),            # x tile
                pl.BlockSpec((H, bm), lambda i: (0, i)),            # h tile
                pl.BlockSpec((3 * H, H + I), lambda i: (0, 0)),     # W (resident)
                pl.BlockSpec((3 * H, 1), lambda i: (0, 0)),         # bias (resident)
            ],
            out_specs=pl.BlockSpec((H, bm), lambda i: (0, i)),
        ),
        compiler_params=pltpu.CompilerParams(
            dimension_semantics=("parallel",)),
    )(x_t, h_t, w_t, b_t)


def block_gru_sequence_t(x_seq_t, h0_t, w_t, b_t):
    """Fused T-step recurrence. x_seq_t:(T,I,B), h0_t:(H,B) -> hseq_t:(T,H,B).

    h stays resident in a VMEM f32 scratch across the (sequential) time axis;
    only x tiles stream in and per-step h tiles stream out."""
    T, I, B = x_seq_t.shape
    H = h0_t.shape[0]
    assert w_t.shape == (3 * H, H + I)
    assert b_t.shape == (3 * H, 1)

    bm = _choose_bm(B)
    grid = (B // bm, T)  # batch (parallel) outer, time (arbitrary) innermost

    return pl.pallas_call(
        _block_gru_seq_kernel,
        out_shape=jax.ShapeDtypeStruct((T, H, B), h0_t.dtype),
        grid_spec=pltpu.PrefetchScalarGridSpec(
            num_scalar_prefetch=0,
            grid=grid,
            in_specs=[
                pl.BlockSpec((None, I, bm), lambda i, t: (t, 0, i)),   # x at step t
                pl.BlockSpec((H, bm), lambda i, t: (0, i)),            # h0 (read at t=0)
                pl.BlockSpec((3 * H, H + I), lambda i, t: (0, 0)),     # W (resident)
                pl.BlockSpec((3 * H, 1), lambda i, t: (0, 0)),         # bias (resident)
            ],
            out_specs=pl.BlockSpec((None, H, bm), lambda i, t: (t, 0, i)),
            scratch_shapes=[pltpu.VMEM((H, bm), jnp.float32)],          # resident h
        ),
        compiler_params=pltpu.CompilerParams(
            dimension_semantics=("parallel", "arbitrary")),
    )(x_seq_t, h0_t, w_t, b_t)
    # TODO(synk): if the production dtype allows, cast x/h/W to bf16 for the
    # MXU (keep f32 accumulation + f32 elementwise) on v6e/v7x for ~2x MXU
    # throughput and half the activation traffic.


# --------------------------------------------------------------------------
# Convenience wrapper matching the PyTorch call signature (layout plumbing
# only; for recurrences keep the transposed layout end-to-end and call the
# *_t entry points directly with pre-built params).
# --------------------------------------------------------------------------
def block_gru_cell(x, h, weight, bias):
    """x:(B,I), h:(B,H), weight:(G,out_per,in_per), bias:(3H,) -> (B,H)."""
    H = h.shape[-1]
    w_t, b_t = prepare_block_gru_params(weight, bias, H)
    h_new_t = block_gru_cell_step_t(x.T, h.T, w_t, b_t)
    return h_new_t.T


# --------------------------------------------------------------------------
# Pure-JAX reference (mirrors the PyTorch forward exactly)
# --------------------------------------------------------------------------
def block_gru_cell_ref(x, h, weight, bias):
    B, _ = x.shape
    H = h.shape[-1]
    G, out_per, in_per = weight.shape
    hx = jnp.concatenate([h, x], axis=-1)
    xg = hx.reshape(B, G, in_per)
    out = jnp.einsum('bgi,goi->bgo', xg, weight).reshape(B, -1) + bias
    r, c, u = out[:, :H], out[:, H:2 * H], out[:, 2 * H:]
    reset = jax.nn.sigmoid(r)
    cand = jnp.tanh(reset * c)
    update = jax.nn.sigmoid(u)
    return update * cand + (1.0 - update) * h


if __name__ == "__main__":
    # Small shapes consistent with the module.
    batch = 2
    input_size = 16
    hidden_size = 32
    num_blocks = 4
    seq_len = 8

    in_features = input_size + hidden_size
    out_features = 3 * hidden_size
    in_per = in_features // num_blocks
    out_per = out_features // num_blocks

    key = jax.random.PRNGKey(0)
    kx, kh, kw, kb, kx2, kh2, kxs = jax.random.split(key, 7)

    # Deterministic parameters (same shapes/scale as the PyTorch init; bias
    # made nonzero to exercise the bias path).
    scale = (2.0 / (in_features + out_features)) ** 0.5
    weight = jax.random.normal(kw, (num_blocks, out_per, in_per), dtype=jnp.float32) * scale
    bias = 0.1 * jax.random.normal(kb, (out_features,), dtype=jnp.float32)

    # One-time parameter preprocessing.
    w_t, b_t = prepare_block_gru_params(weight, bias, hidden_size)

    step_t = jax.jit(block_gru_cell_step_t)
    seq_t = jax.jit(block_gru_sequence_t)

    # --- single step, tiny batch (full-array block) ---
    x = jax.random.normal(kx, (batch, input_size), dtype=jnp.float32)
    h = jax.random.normal(kh, (batch, hidden_size), dtype=jnp.float32)
    h_new = step_t(x.T, h.T, w_t, b_t).T
    jax.block_until_ready(h_new)
    h_ref = block_gru_cell_ref(x, h, weight, bias)
    assert h_new.shape == (batch, hidden_size)
    assert jnp.allclose(h_new, h_ref, atol=1e-5, rtol=1e-5), "mismatch vs reference (B=2)"

    # --- single step, lane-dense batch tile (B multiple of 128) ---
    B2 = 256
    x2 = jax.random.normal(kx2, (B2, input_size), dtype=jnp.float32)
    h2 = jax.random.normal(kh2, (B2, hidden_size), dtype=jnp.float32)
    h2_new = step_t(x2.T, h2.T, w_t, b_t).T
    jax.block_until_ready(h2_new)
    h2_ref = block_gru_cell_ref(x2, h2, weight, bias)
    assert jnp.allclose(h2_new, h2_ref, atol=1e-5, rtol=1e-5), "mismatch vs reference (B=256)"

    # --- fused T-step recurrence (h resident in VMEM across the time axis) ---
    x_seq = jax.random.normal(kxs, (seq_len, B2, input_size), dtype=jnp.float32)
    x_seq_t = jnp.transpose(x_seq, (0, 2, 1))                     # (T, I, B)
    hseq_t = seq_t(x_seq_t, h2.T, w_t, b_t)                       # (T, H, B)
    jax.block_until_ready(hseq_t)

    h_cur = h2
    refs = []
    for t in range(seq_len):
        h_cur = block_gru_cell_ref(x_seq[t], h_cur, weight, bias)
        refs.append(h_cur)
    hseq_ref = jnp.stack(refs)                                    # (T, B, H)
    hseq = jnp.transpose(hseq_t, (0, 2, 1))                       # (T, B, H)
    assert jnp.allclose(hseq, hseq_ref, atol=1e-4, rtol=1e-4), "mismatch vs reference (sequence)"

    print("KERNEL_OK")
</pallas_src>

<mosaic_0001>
module attributes {stable_mosaic.version = 11 : i64} {
  func.func @_block_gru_step_kernel(%arg0: i32, %arg1: memref<16x2xf32, #tpu.memory_space<vmem>>, %arg2: memref<32x2xf32, #tpu.memory_space<vmem>>, %arg3: memref<96x48xf32, #tpu.memory_space<vmem>>, %arg4: memref<96x1xf32, #tpu.memory_space<vmem>>, %arg5: memref<32x2xf32, #tpu.memory_space<vmem>>) attributes {dimension_semantics = [#tpu.dimension_semantics<parallel>], iteration_bounds = array<i64: 1>, scalar_prefetch = 0 : i64, scratch_operands = 0 : i64, tpu.core_type = #tpu.core_type<tc>, window_params = [{transform_indices = @transform_0, window_bounds = array<i64: 16, 2>}, {transform_indices = @transform_1, window_bounds = array<i64: 32, 2>}, {pipeline_mode = #tpu.pipeline_mode<synchronous>, transform_indices = @transform_2, window_bounds = array<i64: 96, 48>}, {pipeline_mode = #tpu.pipeline_mode<synchronous>, transform_indices = @transform_3, window_bounds = array<i64: 96, 1>}, {transform_indices = @transform_4, window_bounds = array<i64: 32, 2>}]} {
    %c0 = arith.constant 0 : index
    %c0_0 = arith.constant 0 : index
    %0 = vector.load %arg2[%c0, %c0_0] : memref<32x2xf32, #tpu.memory_space<vmem>>, vector<32x2xf32>
    %c0_1 = arith.constant 0 : index
    %c0_2 = arith.constant 0 : index
    %1 = vector.load %arg1[%c0_1, %c0_2] : memref<16x2xf32, #tpu.memory_space<vmem>>, vector<16x2xf32>
    %2 = tpu.concatenate %0, %1 in 0 : vector<32x2xf32>, vector<16x2xf32> -> vector<48x2xf32>
    %c0_3 = arith.constant 0 : index
    %c0_4 = arith.constant 0 : index
    %3 = vector.load %arg3[%c0_3, %c0_4] : memref<96x48xf32, #tpu.memory_space<vmem>>, vector<96x48xf32>
    %cst = arith.constant dense<0.000000e+00> : vector<96x2xf32>
    %4 = tpu.matmul %3, %2, %cst {dimension_numbers = #tpu.dot_dimension_numbers<[1], [0], [0], [1], [0, 0, 1, 1], [], []>} : vector<96x48xf32>, vector<48x2xf32>, vector<96x2xf32> -> vector<96x2xf32>
    %c0_5 = arith.constant 0 : index
    %c0_6 = arith.constant 0 : index
    %5 = vector.load %arg4[%c0_5, %c0_6] : memref<96x1xf32, #tpu.memory_space<vmem>>, vector<96x1xf32>
    %6 = vector.broadcast %5 : vector<96x1xf32> to vector<96x2xf32>
    %7 = arith.addf %4, %6 : vector<96x2xf32>
    %8 = vector.extract_strided_slice %7 {offsets = [0, 0], sizes = [32, 2], strides = [1, 1]} : vector<96x2xf32> to vector<32x2xf32>
    %9 = arith.negf %8 : vector<32x2xf32>
    %10 = math.exp %9 : vector<32x2xf32>
    %cst_7 = arith.constant 1.000000e+00 : f32
    %11 = vector.broadcast %cst_7 : f32 to vector<32x2xf32>
    %12 = arith.addf %11, %10 : vector<32x2xf32>
    %13 = arith.divf %11, %12 : vector<32x2xf32>
    %14 = vector.extract_strided_slice %7 {offsets = [32, 0], sizes = [32, 2], strides = [1, 1]} : vector<96x2xf32> to vector<32x2xf32>
    %15 = arith.mulf %13, %14 : vector<32x2xf32>
    %16 = math.tanh %15 : vector<32x2xf32>
    %17 = vector.extract_strided_slice %7 {offsets = [64, 0], sizes = [32, 2], strides = [1, 1]} : vector<96x2xf32> to vector<32x2xf32>
    %18 = arith.negf %17 : vector<32x2xf32>
    %19 = math.exp %18 : vector<32x2xf32>
    %cst_8 = arith.constant 1.000000e+00 : f32
    %20 = vector.broadcast %cst_8 : f32 to vector<32x2xf32>
    %21 = arith.addf %20, %19 : vector<32x2xf32>
    %22 = arith.divf %20, %21 : vector<32x2xf32>
    %23 = arith.mulf %22, %16 : vector<32x2xf32>
    %cst_9 = arith.constant 1.000000e+00 : f32
    %24 = vector.broadcast %cst_9 : f32 to vector<32x2xf32>
    %25 = arith.subf %24, %22 : vector<32x2xf32>
    %26 = arith.mulf %25, %0 : vector<32x2xf32>
    %27 = arith.addf %23, %26 : vector<32x2xf32>
    %c0_10 = arith.constant 0 : index
    %c0_11 = arith.constant 0 : index
    %28 = vector.load %arg5[%c0_10, %c0_11] : memref<32x2xf32, #tpu.memory_space<vmem>>, vector<32x2xf32>
    tpu.vector_store %arg5[%c0_10, %c0_11], %27 {strides = array<i32>} : memref<32x2xf32, #tpu.memory_space<vmem>>, vector<32x2xf32>,
    return
  }
  func.func @transform_0(%arg0: i32) -> (i32, i32) {
    %c0_i32 = arith.constant 0 : i32
    %c0_i32_0 = arith.constant 0 : i32
    return %c0_i32, %arg0 : i32, i32
  }
  func.func @transform_1(%arg0: i32) -> (i32, i32) {
    %c0_i32 = arith.constant 0 : i32
    %c0_i32_0 = arith.constant 0 : i32
    return %c0_i32, %arg0 : i32, i32
  }
  func.func @transform_2(%arg0: i32) -> (i32, i32) {
    %c0_i32 = arith.constant 0 : i32
    %c0_i32_0 = arith.constant 0 : i32
    %c0_i32_1 = arith.constant 0 : i32
    return %c0_i32, %c0_i32_0 : i32, i32
  }
  func.func @transform_3(%arg0: i32) -> (i32, i32) {
    %c0_i32 = arith.constant 0 : i32
    %c0_i32_0 = arith.constant 0 : i32
    %c0_i32_1 = arith.constant 0 : i32
    return %c0_i32, %c0_i32_0 : i32, i32
  }
  func.func @transform_4(%arg0: i32) -> (i32, i32) {
    %c0_i32 = arith.constant 0 : i32
    %c0_i32_0 = arith.constant 0 : i32
    return %c0_i32, %arg0 : i32, i32
  }
}

</mosaic_0001>

<bundles_post_ra>
// kernel: block_gru_cell_step_t.1
= control target key start
LH: loop header
LB: loop body
LE: loop exit
PB: predicated region body
PF: predicated region fallthrough
CT: control target
= control target key end

     0   :  { %v473_v2 = vmov 0   ;;  %vm107_vm0 = vcmask 392192   ;;  %vm341_vm1 = vcmask 15360   ;;  %s651_s0 = inlined_call_operand.vmem [shape: f32[16,2], index: 0, kind: input, shape index: {}]   ;;  %s652_s1 = inlined_call_operand.vmem [shape: f32[32,2], index: 1, kind: input, shape index: {}]   ;;  %s653_s2 = inlined_call_operand.vmem [shape: f32[96,48], index: 2, kind: input, shape index: {}]   ;;  %s654_s3 = inlined_call_operand.vmem [shape: f32[96,1], index: 3, kind: input, shape index: {}]   ;;  %s655_s4 = inlined_call_operand.vmem [shape: f32[32,2], index: 4, kind: output, shape index: {}]  }
   0x1   :  { %v22_v0 = vld [vmem:[%s651_s0 + $0x8] sm:$0xff]  ;;  %v21_v1 = vld [vmem:[%s651_s0] sm:$0xff]  ;;  %432 = vset.pattern.permute.xlu1 %v473_v2  ;;  %431 = vset.pattern.permute.xlu0 %v473_v2  ;;  %v508_v3 = vld [vmem:[%s652_s1 + $0x18] sm:$0xff] }
   0x2   :  { %388 = vmatprep.subr.mxu0 %v22_v0  ;;  %418 = vmatprep.subr.mxu1 %v22_v0  ;;  %v513_v4 = vld [vmem:[%s652_s1 + $0x10] sm:$0xff]  ;;  %v522_v5 = vld [vmem:[%s652_s1 + $0x8] sm:$0xff]  ;;  %v531_v6 = vld [vmem:[%s652_s1] sm:$0xff] }
   0x3   :  { %389 = vmatpush3.msra.mxu0 %v22_v0  ;;  %424 = vmatpush3.msra.mxu1 %v22_v0  ;;  %v23_v7 = vld [vmem:[%s653_s2] sm:$0xff]  ;;  %v29_v8 = vld [vmem:[%s653_s2 + $0x30] sm:$0xff]  ;;  %v24_v9 = vld [vmem:[%s653_s2 + $0x8] sm:$0xff] }
   0x4   :  { %390 = vmatprep.subr.mxu0 %v21_v1  ;;  %419 = vmatprep.subr.mxu1 %v21_v1  ;;  %v30_v10 = vld [vmem:[%s653_s2 + $0x38] sm:$0xff]  ;;  %v25_v11 = vld [vmem:[%s653_s2 + $0x10] sm:$0xff]  ;;  %v31_v12 = vld [vmem:[%s653_s2 + $0x40] sm:$0xff] }
   0x5   :  { %391 = vmatpush3.msra.mxu0 %v21_v1  ;;  %425 = vmatpush3.msra.mxu1 %v21_v1  ;;  %v37_v13 = vld [vmem:[%s654_s3 + $0x10] sm:$0xff]  ;;  %v35_v14 = vld [vmem:[%s654_s3] sm:$0xff]  ;;  %v26_v15 = vld [vmem:[%s653_s2 + $0x18] sm:$0xff] }
   0x6   :  { %392 = vmatprep.subr.mxu0 %v508_v3  ;;  %420 = vmatprep.subr.mxu1 %v508_v3  ;;  %v32_v16 = vld [vmem:[%s653_s2 + $0x48] sm:$0xff]  ;;  %v27_v17 = vld [vmem:[%s653_s2 + $0x20] sm:$0xff]  ;;  %v33_v18 = vld [vmem:[%s653_s2 + $0x50] sm:$0xff] }
   0x7   :  { %393 = vmatpush3.msra.mxu0 %v508_v3  ;;  %426 = vmatpush3.msra.mxu1 %v508_v3  ;;  %v38_v19 = vld [vmem:[%s654_s3 + $0x18] sm:$0xff]  ;;  %v36_v20 = vld [vmem:[%s654_s3 + $0x8] sm:$0xff]  ;;  %v43_v24 = vld [vmem:[%s654_s3 + $0x40] sm:$0xff] }
   0x8   :  { %394 = vmatprep.subr.mxu0 %v513_v4  ;;  %421 = vmatprep.subr.mxu1 %v513_v4  ;;  %v28_v21 = vld [vmem:[%s653_s2 + $0x28] sm:$0xff]  ;;  %v34_v22 = vld [vmem:[%s653_s2 + $0x58] sm:$0xff]  ;;  %v45_v26 = vld [vmem:[%s654_s3 + $0x50] sm:$0xff] }
   0x9   :  { %395 = vmatpush3.msra.mxu0 %v513_v4  ;;  %427 = vmatpush3.msra.mxu1 %v513_v4  ;;  %v44_v23 = vld [vmem:[%s654_s3 + $0x48] sm:$0xff]  ;;  %v46_v25 = vld [vmem:[%s654_s3 + $0x58] sm:$0xff]  ;;  %v39_v28 = vld [vmem:[%s654_s3 + $0x20] sm:$0xff] }
   0xa   :  { %396 = vmatprep.subr.mxu0 %v522_v5  ;;  %422 = vmatprep.subr.mxu1 %v522_v5  ;;  %v40_v27 = vld [vmem:[%s654_s3 + $0x28] sm:$0xff]  ;;  %v42_v29 = vld [vmem:[%s654_s3 + $0x38] sm:$0xff]  ;;  %v41_v30 = vld [vmem:[%s654_s3 + $0x30] sm:$0xff] }
   0xb   :  { %397 = vmatpush3.msra.mxu0 %v522_v5  ;;  %428 = vmatpush3.msra.mxu1 %v522_v5 }
   0xc   :  { %398 = vmatprep.subr.mxu0 %v531_v6  ;;  %423 = vmatprep.subr.mxu1 %v531_v6 }
   0xd   :  { %399 = vmatpush3.msra.mxu0 %v531_v6  ;;  %429 = vmatpush3.msra.mxu1 %v531_v6 }
   0xe   :  { %400 = vmatprep.mubr.msk.f32.mxu0 %vm107_vm0, %v23_v7  ;;  %409 = vmatprep.mubr.msk.f32.mxu1 %vm107_vm0, %v29_v8 }
   0xf   :  { %401 = vmatmul.mubr.msk.f32.vlgmr.msra.gmra.mxu0 %vm107_vm0, %v24_v9  ;;  %410 = vmatmul.mubr.msk.f32.vlgmr.msra.gmra.mxu1 %vm107_vm0, %v30_v10 }
  0x10   :  { %403 = vmatprep.mubr.msk.f32.mxu0 %vm107_vm0, %v25_v11  ;;  %412 = vmatprep.mubr.msk.f32.mxu1 %vm107_vm0, %v31_v12 }
  0x11   :  { %59 = vperm.xlu1 %432, %v37_v13   ;;  %49 = vperm.xlu0 %431, %v35_v14  }
  0x13   :  { %404 = vmatmul.mubr.msk.f32.gmra.mxu0 %vm107_vm0, %v26_v15  ;;  %413 = vmatmul.mubr.msk.f32.gmra.mxu1 %vm107_vm0, %v32_v16 }
  0x14   :  { %406 = vmatprep.mubr.msk.f32.mxu0 %vm107_vm0, %v27_v17  ;;  %415 = vmatprep.mubr.msk.f32.mxu1 %vm107_vm0, %v33_v18 }
  0x15   :  { %64 = vperm.xlu1 %432, %v38_v19   ;;  %54 = vperm.xlu0 %431, %v36_v20  }
  0x17   :  { %407 = vmatmul.mubr.msk.f32.gmra.mxu0 %vm107_vm0, %v28_v21  ;;  %416 = vmatmul.mubr.msk.f32.gmra.mxu1 %vm107_vm0, %v34_v22 }
  0x19   :  { %94 = vperm.xlu1 %432, %v44_v23   ;;  %89 = vperm.xlu0 %431, %v43_v24  }
  0x1d   :  { %104 = vperm.xlu1 %432, %v46_v25   ;;  %99 = vperm.xlu0 %431, %v45_v26  }
  0x21   :  { %74 = vperm.xlu1 %432, %v40_v27   ;;  %69 = vperm.xlu0 %431, %v39_v28  }
  0x25   :  { %84 = vperm.xlu1 %432, %v42_v29   ;;  %79 = vperm.xlu0 %431, %v41_v30  }
  0x8c   :  { %v60_v31 = vpop.permute.xlu1 %59  ;;  %v50_v32 = vpop.permute.xlu0 %49 }
  0x90   :  { %v65_v33 = vpop.permute.xlu1 %64  ;;  %v55_v34 = vpop.permute.xlu0 %54 }
  0x94   :  { %v95_v37 = vpop.permute.xlu1 %94  ;;  %v90_v41 = vpop.permute.xlu0 %89 }
  0x98   :  { %v105_v54 = vpop.permute.xlu1 %104  ;;  %v100_v59 = vpop.permute.xlu0 %99 }
  0x9c   :  { %v75_v17 = vpop.permute.xlu1 %74  ;;  %v70_v21 = vpop.permute.xlu0 %69 }
  0xa0   :  { %v85_v27 = vpop.permute.xlu1 %84 }
  0xcf   :  { %v402_v35 = vpop.f32.mrf.mxu0  ;;  %v625_v36 = vpop.f32.mrf.mxu1 }
  0xd0   :  { %v216_v38 = vadd.f32 %v402_v35, %v55_v34 }
  0xd1   :  { %v210_v39 = vpop.f32.mrf.mxu0  ;;  %v627_v40 = vpop.f32.mrf.mxu1 }
  0xd2   :  { %v363_v42 = vmul.f32 -1.442695, %v216_v38  ;;  %v211_v43 = vadd.f32 %v210_v39, %v50_v32  ;;  %v246_v32 = vadd.f32 %v625_v36, %v85_v27 }
  0xd3   :  { %v405_v44 = vpop.f32.mrf.mxu0  ;;  %v414_v45 = vpop.f32.mrf.mxu1 }
  0xd4   :  { %433 = vpow2.f32 %v363_v42  ;;  %v362_v46 = vmul.f32 -1.442695, %v211_v43  ;;  %v226_v47 = vadd.f32 %v405_v44, %v65_v33  ;;  %v256_v48 = vadd.f32 %v414_v45, %v95_v37 }
  0xd5   :  { %v220_v49 = vpop.f32.mrf.mxu0  ;;  %v250_v50 = vpop.f32.mrf.mxu1 }
  0xd6   :  { %435 = vpow2.f32 %v362_v46  ;;  %v365_v51 = vmul.f32 -1.442695, %v226_v47  ;;  %v367_v52 = vmul.f32 -1.442695, %v256_v48  ;;  %v221_v53 = vadd.f32 %v220_v49, %v60_v31  ;;  %v80_v31 = vpop.permute.xlu0 %79 }
  0xd7   :  { %v251_v55 = vadd.f32 %v250_v50, %v90_v41  ;;  %v417_v56 = vpop.f32.mrf.mxu1  ;;  %v408_v18 = vpop.f32.mrf.mxu0  ;;  %v241_v35 = vadd.f32 %v627_v40, %v80_v31 }
  0xd8   :  { %437 = vpow2.f32 %v365_v51  ;;  %v364_v57 = vmul.f32 -1.442695, %v221_v53  ;;  %v266_v58 = vadd.f32 %v417_v56, %v105_v54  ;;  %v236_v25 = vadd.f32 %v408_v18, %v75_v17 }
  0xd9   :  { %439 = vpow2.f32 %v367_v52  ;;  %v366_v60 = vmul.f32 -1.442695, %v251_v55  ;;  %v260_v61 = vpop.f32.mrf.mxu1  ;;  %v230_v23 = vpop.f32.mrf.mxu0 }
  0xda   :  { %441 = vpow2.f32 %v364_v57  ;;  %v369_v62 = vmul.f32 -1.442695, %v266_v58  ;;  %v261_v63 = vadd.f32 %v260_v61, %v100_v59  ;;  %v231_v29 = vadd.f32 %v230_v23, %v70_v21 }
  0xdb   :  { %443 = vpow2.f32 %v366_v60 }
  0xdc   :  { %v368_v0 = vmul.f32 -1.442695, %v261_v63  ;;  %445 = vpow2.f32 %v369_v62 }
  0xde   :  { %447 = vpow2.f32 %v368_v0 }
  0xe1   :  { %v434_v1 = vpop.eup %433 }
  0xe2   :  { %v282_v2 = vadd.f32 1.0, %v434_v1 }
  0xe3   :  { %v436_v7 = vpop.eup %435 }
  0xe4   :  { %449 = vrcp.f32 %v282_v2  ;;  %v281_v8 = vadd.f32 1.0, %v436_v7 }
  0xe5   :  { %v438_v9 = vpop.eup %437 }
  0xe6   :  { %v440_v10 = vpop.eup %439  ;;  %451 = vrcp.f32 %v281_v8  ;;  %v284_v11 = vadd.f32 1.0, %v438_v9 }
  0xe7   :  { %v442_v12 = vpop.eup %441  ;;  %v314_v15 = vadd.f32 1.0, %v440_v10 }
  0xe8   :  { %453 = vrcp.f32 %v284_v11  ;;  %v283_v13 = vadd.f32 1.0, %v442_v12  ;;  %v444_v14 = vpop.eup %443 }
  0xe9   :  { %v446_v16 = vpop.eup %445  ;;  %v313_v20 = vadd.f32 1.0, %v444_v14 }
  0xea   :  { %455 = vrcp.f32 %v283_v13  ;;  %v316_v22 = vadd.f32 1.0, %v446_v16 }
  0xeb   :  { %v448_v19 = vpop.eup %447  ;;  %457 = vrcp.f32 %v314_v15 }
  0xec   :  { %v315_v24 = vadd.f32 1.0, %v448_v19  ;;  %459 = vrcp.f32 %v313_v20 }
  0xed   :  { %461 = vrcp.f32 %v316_v22 }
  0xee   :  { %463 = vrcp.f32 %v315_v24 }
  0xf1   :  { %v450_v26 = vpop.eup %449 }
  0xf2   :  { %v294_v28 = vmul.f32 %v450_v26, %v236_v25 }
  0xf3   :  { %v452_v30 = vpop.eup %451 }
  0xf4   :  { %465 = vtanh.f32 %v294_v28  ;;  %v293_v33 = vmul.f32 %v452_v30, %v231_v29 }
  0xf5   :  { %v454_v34 = vpop.eup %453 }
  0xf6   :  { %v296_v37 = vmul.f32 %v454_v34, %v246_v32  ;;  %467 = vtanh.f32 %v293_v33 }
  0xf7   :  { %v456_v38 = vpop.eup %455 }
  0xf8   :  { %469 = vtanh.f32 %v296_v37  ;;  %v295_v39 = vmul.f32 %v456_v38, %v241_v35  ;;  %v458_v41 = vpop.eup %457 }
  0xf9   :  { %v460_v42 = vpop.eup %459  ;;  %v330_v43 = vsub.f32 1.0, %v458_v41 }
  0xfa   :  { %471 = vtanh.f32 %v295_v39  ;;  %v462_v44 = vpop.eup %461  ;;  %v329_v46 = vsub.f32 1.0, %v460_v42 }
  0xfb   :  { %v464_v45 = vpop.eup %463  ;;  %v334_v36 = vmul.f32 %v330_v43, %v522_v5  ;;  %v332_v49 = vsub.f32 1.0, %v462_v44 }
  0xfc   :  { %v333_v52 = vmul.f32 %v329_v46, %v531_v6  ;;  %v331_v53 = vsub.f32 1.0, %v464_v45 }
  0xfd   :  { %v336_v56 = vmul.f32 %v332_v49, %v508_v3 }
  0xfe   :  { %v335_v6 = vmul.f32 %v331_v53, %v513_v4 }
 0x101   :  { %v466_v47 = vpop.eup %465 }
 0x102   :  { %v326_v48 = vmul.f32 %v466_v47, %v458_v41 }
 0x103   :  { %v468_v50 = vpop.eup %467 }
 0x104   :  { %v338_v40 = vadd.f32 %v334_v36, %v326_v48  ;;  %v325_v51 = vmul.f32 %v468_v50, %v460_v42 }
 0x105   :  { %v470_v54 = vpop.eup %469 }
 0x106   :  { %343 = vst.msk [vmem:[%s655_s4 + $0x8] sm:$0xff] %vm341_vm1, %v338_v40  ;;  %v328_v55 = vmul.f32 %v470_v54, %v462_v44  ;;  %v337_v57 = vadd.f32 %v333_v52, %v325_v51 }
 0x107   :  { %v472_v58 = vpop.eup %471 }
 0x108   :  { %v340_v5 = vadd.f32 %v336_v56, %v328_v55  ;;  %342 = vst.msk [vmem:[%s655_s4] sm:$0xff] %vm341_vm1, %v337_v57  ;;  %v327_v59 = vmul.f32 %v472_v58, %v464_v45 }
 0x10a   :  { %345 = vst.msk [vmem:[%s655_s4 + $0x18] sm:$0xff] %vm341_vm1, %v340_v5  ;;  %v339_v60 = vadd.f32 %v335_v6, %v327_v59 }
 0x10c   :  { %344 = vst.msk [vmem:[%s655_s4 + $0x10] sm:$0xff] %vm341_vm1, %v339_v60 }

</bundles_post_ra>
